<compile_context>
chip_gen: v6e
topology: v6e:2x2x1
jax: 0.10.0
libtpu: 0.0.40
codegen_flags: <defaults>
</compile_context>

<pallas_src>
import jax
import jax.numpy as jnp
from jax.experimental import pallas as pl
from jax.experimental.pallas import tpu as pltpu

_LANE = 128
_MAX_LAST_DIM = 32 * 1024        # widest lane-dense last dim we will pick
_MIN_PALLAS_ELEMS = 1 << 20      # below this, an XLA-fused ReLU is cheaper
_MIB = 1024 * 1024


def _relu_kernel(x_ref, o_ref):
    # Elementwise ReLU on the whole VMEM tile (pure VPU op, one vmax per vreg).
    o_ref[...] = jnp.maximum(x_ref[...], jnp.zeros((), x_ref.dtype))


def _tpu_generation_tuning():
    """Return (block_bytes, vmem_limit_bytes) tuned by per-core VMEM size."""
    try:
        vmem_cap = int(pltpu.get_tpu_info().vmem_capacity_bytes)
    except Exception:
        # Conservative default (v7x-class per-TC VMEM) if the query fails.
        vmem_cap = 64 * _MIB
    if vmem_cap <= 64 * _MIB:
        # v7x-class: 64 MiB VMEM per TC.  4 MiB blocks -> 16 MiB live
        # (double-buffered in+out); 40 MiB limit leaves headroom for any
        # future fake-quant scratch.
        return 4 * _MIB, 40 * _MIB
    # v5e / v6e: 128 MiB physical VMEM.  8 MiB blocks -> 32 MiB live; the
    # explicit 48 MiB limit is mandatory on v5e (16 MiB scoped default).
    return 8 * _MIB, 48 * _MIB


def _lane_dense_last_dim(n: int) -> int:
    """Largest multiple-of-128 divisor of n, capped at _MAX_LAST_DIM."""
    assert n % _LANE == 0
    m = n // _LANE
    for d in range(min(m, _MAX_LAST_DIM // _LANE), 0, -1):
        if m % d == 0:
            return d * _LANE
    return _LANE


def _relu_pallas_2d(x2d: jax.Array) -> jax.Array:
    """ReLU on a (rows, C) slab with C a multiple of 128."""
    rows, c = x2d.shape
    itemsize = jnp.dtype(x2d.dtype).itemsize
    n = rows * c

    block_bytes, vmem_limit = _tpu_generation_tuning()

    # Packed dtypes stack along sublanes: keep row tiles a multiple of the
    # packed tile height (8 for f32, 16 for bf16, 32 for int8/fp8) so loads
    # and stores stay unmasked on every grid step.
    sublane_mult = max(8, 32 // itemsize)

    block_elems = max(_LANE, block_bytes // itemsize)
    tile_rows = max(1, block_elems // c)
    if tile_rows >= rows:
        # Single block covers the full first extent (valid even when rows is
        # not a multiple of the sublane tile: block dim equals the array dim).
        tile_rows = rows
    else:
        tile_rows = max(sublane_mult, (tile_rows // sublane_mult) * sublane_mult)
        tile_rows = min(tile_rows, rows)

    # Keep the "parallel" grid axis shardable across v7x's 2 TensorCores: if a
    # huge block collapsed the grid to one step, halve it so both cores work.
    num_steps = pl.cdiv(rows, tile_rows)
    while num_steps < 2 and tile_rows > sublane_mult:
        tile_rows = max(sublane_mult,
                        ((tile_rows // 2) // sublane_mult) * sublane_mult)
        num_steps = pl.cdiv(rows, tile_rows)

    cost = pl.CostEstimate(
        flops=n,
        transcendentals=0,
        bytes_accessed=2 * n * itemsize,   # one full read + one full write
    )

    return pl.pallas_call(
        _relu_kernel,
        out_shape=jax.ShapeDtypeStruct((rows, c), x2d.dtype),
        grid_spec=pltpu.PrefetchScalarGridSpec(
            num_scalar_prefetch=0,
            grid=(num_steps,),            # ragged last block is masked by Pallas
            in_specs=[pl.BlockSpec((tile_rows, c), lambda i: (i, 0))],
            out_specs=pl.BlockSpec((tile_rows, c), lambda i: (i, 0)),
        ),
        compiler_params=pltpu.CompilerParams(
            dimension_semantics=("parallel",),
            vmem_limit_bytes=vmem_limit,
        ),
        cost_estimate=cost,
    )(x2d)


def relu_wrap(
    x: jax.Array,
    *,
    min_pallas_elems: int = _MIN_PALLAS_ELEMS,
    force_pallas: bool = False,
) -> jax.Array:
    """Forward pass of ReluWrap: quant (identity) -> ReLU -> dequant (identity)."""
    n = x.size
    if n == 0:
        return x

    lane_aligned = (n % _LANE) == 0
    use_pallas = lane_aligned and (force_pallas or n >= min_pallas_elems)
    if not use_pallas:
        # Small tensors: a standalone pallas_call's fixed launch/pipeline cost
        # dwarfs the work; letting XLA fuse the ReLU into the producing op also
        # eliminates both HBM passes entirely — the biggest possible win.
        # Non-128-multiple flat lengths: a pad + slice would add whole extra
        # HBM passes, which costs more than the op itself.
        return jnp.maximum(x, jnp.zeros((), x.dtype))

    # Widest lane-dense last dim (multiple of 128) dividing the flat length, so
    # blocks are wide, stores are unmasked, and the reshape is zero-copy.
    c = _lane_dense_last_dim(n)
    rows = n // c

    x2d = x.reshape(rows, c)          # pure reshape: no pad, no extra HBM pass
    out2d = _relu_pallas_2d(x2d)
    return out2d.reshape(x.shape)


if __name__ == "__main__":
    key0, key1 = jax.random.split(jax.random.PRNGKey(0))

    # Small NCHW input consistent with how ReluWrap is used in EfficientNet.
    x = jax.random.normal(key0, (2, 4, 16, 16), dtype=jnp.float32)
    y = jax.block_until_ready(relu_wrap(x, force_pallas=True))  # run the kernel
    y_ref = jnp.maximum(x, 0.0)
    assert y.shape == x.shape and y.dtype == x.dtype
    assert bool(jnp.allclose(y, y_ref)), "Pallas ReLU mismatch vs reference"

    # Larger lane-aligned bf16 input exercises dtype-aware tiling + masked tail.
    xb = jax.random.normal(key1, (2, 24, 56, 56), dtype=jnp.bfloat16)
    yb = jax.block_until_ready(relu_wrap(xb, force_pallas=True))
    assert bool(jnp.allclose(yb, jnp.maximum(xb, jnp.bfloat16(0)))), "bf16 mismatch"

    # Non-lane-aligned shape exercises the fused (non-Pallas) fallback path.
    x2 = jax.random.normal(key1, (2, 3, 17, 19), dtype=jnp.float32)
    y2 = jax.block_until_ready(relu_wrap(x2))
    assert bool(jnp.allclose(y2, jnp.maximum(x2, 0.0))), "fallback ReLU mismatch"

    print("KERNEL_OK")
</pallas_src>

<mosaic_0001>
module attributes {stable_mosaic.version = 11 : i64} {
  func.func @_relu_kernel(%arg0: i32, %arg1: memref<1x2048xf32, #tpu.memory_space<vmem>>, %arg2: memref<1x2048xf32, #tpu.memory_space<vmem>>) attributes {dimension_semantics = [#tpu.dimension_semantics<parallel>], iteration_bounds = array<i64: 1>, scalar_prefetch = 0 : i64, scratch_operands = 0 : i64, tpu.core_type = #tpu.core_type<tc>, window_params = [{transform_indices = @transform_0, window_bounds = array<i64: 1, 2048>}, {transform_indices = @transform_1, window_bounds = array<i64: 1, 2048>}]} {
    %c0 = arith.constant 0 : index
    %c0_0 = arith.constant 0 : index
    %0 = vector.load %arg1[%c0, %c0_0] : memref<1x2048xf32, #tpu.memory_space<vmem>>, vector<1x2048xf32>
    %cst = arith.constant 0.000000e+00 : f32
    %1 = vector.broadcast %cst : f32 to vector<1x2048xf32>
    %2 = arith.maximumf %0, %1 : vector<1x2048xf32>
    %c0_1 = arith.constant 0 : index
    %c0_2 = arith.constant 0 : index
    %3 = vector.load %arg2[%c0_1, %c0_2] : memref<1x2048xf32, #tpu.memory_space<vmem>>, vector<1x2048xf32>
    tpu.vector_store %arg2[%c0_1, %c0_2], %2 {strides = array<i32>} : memref<1x2048xf32, #tpu.memory_space<vmem>>, vector<1x2048xf32>,
    return
  }
  func.func @transform_0(%arg0: i32) -> (i32, i32) {
    %c0_i32 = arith.constant 0 : i32
    %c0_i32_0 = arith.constant 0 : i32
    return %arg0, %c0_i32 : i32, i32
  }
  func.func @transform_1(%arg0: i32) -> (i32, i32) {
    %c0_i32 = arith.constant 0 : i32
    %c0_i32_0 = arith.constant 0 : i32
    return %arg0, %c0_i32 : i32, i32
  }
}

</mosaic_0001>

<bundles_post_ra>
// kernel: tpu_custom_call.1
= control target key start
LH: loop header
LB: loop body
LE: loop exit
PB: predicated region body
PF: predicated region fallthrough
CT: control target
= control target key end

     0   :  { %6 = vsyncpa [#allocation3], 0  ;;  %s106_s0 = inlined_call_operand.hbm [shape: f32[1,2048], index: 0, kind: input, shape index: {}]   ;;  %s107_s1 = inlined_call_operand.hbm [shape: f32[1,2048], index: 1, kind: output, shape index: {}]  }
   0x1   :  { %7 = vsyncpa [#allocation4], 0  ;;  %s88_s6 = smov [#allocation2]  }
   0x2   :  { %s14_s7 = sshll.u32 %s88_s6, 4  ;;  %s15_s7 = int_to_ptr.vmem [resolvable:$true] %s14_s7 }
   0x3   :  { %s52_s8 = scalar_lea.vmem %s15_s7, 256  ;;  %p57_p1 = scmp.lt.s32.totalorder %s15_s7, %s15_s7 }
   0x4   :  { %p53_p0 = scmp.ne.s32.totalorder %s15_s7, %s52_s8  ;;  %p58_p2 = scmp.lt.s32.totalorder %s52_s8, %s52_s8 }
   0x6   :  { %p59_p3 = por %p58_p2, %p57_p1 }
   0x8   :  { %p60_p4 = pnand %p59_p3, %p53_p0 }
   0xa   :  { %63 = shalt.err (!%p60_p4)
}
   0xb   :  { %17 = dma.hbm_to_vmem [thread:$0]  %s106_s0, 256, %s15_s7, [#allocation3]  }
   0xc   :  { %84 = dma.done.wait [#allocation3], 256  }
   0xd   :  { %85 = vsyncadd [#allocation3], 4294967040  ;;  %s89_s11 = smov [#allocation5]   ;;  %v21_v0 = vld [vmem:[#allocation2] sm:$0xff]  ;;  %v22_v1 = vld [vmem:[#allocation2 + $0x8] sm:$0xff] }
   0xe   :  { %s33_s12 = sshll.u32 %s89_s11, 4  ;;  %v23_v2 = vmax.f32 %v21_v0, 0.0  ;;  %v24_v3 = vmax.f32 %v22_v1, 0.0  ;;  %s34_s12 = int_to_ptr.vmem [resolvable:$true] %s33_s12 }
   0xf   :  { %s64_s13 = scalar_lea.vmem %s34_s12, 256  ;;  %p69_p6 = scmp.lt.s32.totalorder %s34_s12, %s34_s12 }
  0x10   :  { %25 = vst [vmem:[#allocation5] sm:$0xff] %v23_v2  ;;  %26 = vst [vmem:[#allocation5 + $0x8] sm:$0xff] %v24_v3  ;;  %p65_p5 = scmp.ne.s32.totalorder %s34_s12, %s64_s13  ;;  %p70_p7 = scmp.lt.s32.totalorder %s64_s13, %s64_s13 }
  0x12   :  { %p71_p8 = por %p70_p7, %p69_p6 }
  0x14   :  { %p72_p9 = pnand %p71_p8, %p65_p5 }
  0x16   :  { %75 = shalt.err (!%p72_p9)
}
  0x17   :  { %36 = dma.vmem_to_hbm [thread:$0]  %s34_s12, 256, %s107_s1, [#allocation4]  }
  0x18   :  { %86 = dma.done.wait [#allocation4], 256  }
  0x19   :  { %87 = vsyncadd [#allocation4], 4294967040 }
  0x1a   :  { %40 = vsyncpa [#allocation3], 1 }
  0x1b   :  { %41 = vsyncpa [#allocation4], 1 }

</bundles_post_ra>
